<compile_context>
chip_gen: v5e
topology: v5e:2x2
jax: 0.10.0
libtpu: 0.0.40
codegen_flags: <defaults>
</compile_context>

<pallas_src>
import functools

import jax
import jax.numpy as jnp
from jax.experimental import pallas as pl
from jax.experimental.pallas import tpu as pltpu


def _ohem_pixel_kernel(score_ref, target_ref, loss_ref, *, ignore_label):
    # score_ref: (C, TS, 128) native dtype ; target_ref: (TS, 128) i32 ; loss_ref: (TS, 128) f32
    logits = score_ref[...].astype(jnp.float32)          # cast after load (bf16 stays bf16 in HBM)
    tgt = target_ref[...]                                 # (TS, 128) int32
    valid = tgt != ignore_label
    t_clamped = jnp.where(valid, tgt, 0)                  # tmp_target[ignore] = 0

    # Reductions over the *leading* class axis -> pure VPU elementwise combines of fully
    # dense (TS, 128) vregs (no sublane/XLU reduction, no sublane padding waste).
    m = jnp.max(logits, axis=0)                            # (TS, 128)
    lse = m + jnp.log(jnp.sum(jnp.exp(logits - m[None]), axis=0))

    # Gather the true-class logit via a class-index compare (no dynamic gather needed).
    cls = jax.lax.broadcasted_iota(jnp.int32, logits.shape, 0)
    logit_t = jnp.sum(jnp.where(cls == t_clamped[None], logits, 0.0), axis=0)

    # nn.CrossEntropyLoss(reduction='none', ignore_index=ignore_label):
    # loss = lse - logit_true for valid pixels, 0 for ignored pixels.  Single dense store.
    loss_ref[...] = jnp.where(valid, lse - logit_t, 0.0)


def _run_pixel_kernel(score_ncsl, target_nsl, ignore_label, tile_pixels=4096):
    """score_ncsl: (N, C, S, 128) native dtype, target_nsl: (N, S, 128) i32.
    Returns per-pixel CE loss of shape (N, S, 128) f32."""
    N, C, S, L = score_ncsl.shape
    itemsize = jnp.dtype(score_ncsl.dtype).itemsize
    sub_mult = max(8, 32 // itemsize)            # sublane granularity: 8 (f32/i32), 16 (bf16)

    # Desired sublane-rows per block (tile_pixels pixels), capped so the double-buffered
    # block (score + target + loss) stays well inside the scoped VMEM limit on every
    # generation (v7x is the smallest: 64 MiB physical / 32 MiB default scoped).
    desired = max(sub_mult, tile_pixels // L)
    vmem_budget = 8 * 1024 * 1024
    bytes_per_row = L * (C * itemsize + 4 + 4) * 2
    desired = min(desired, max(sub_mult, vmem_budget // bytes_per_row))

    if S <= desired:
        tile_s = S                               # full extent is always a legal block size
    else:
        tile_s = S                               # fallback if no aligned divisor is found
        t = (desired // sub_mult) * sub_mult
        while t >= sub_mult:
            if S % t == 0:
                tile_s = t
                break
            t -= sub_mult

    grid = (N, S // tile_s)
    kernel = functools.partial(_ohem_pixel_kernel, ignore_label=ignore_label)
    return pl.pallas_call(
        kernel,
        out_shape=jax.ShapeDtypeStruct((N, S, L), jnp.float32),
        grid=grid,
        in_specs=[
            pl.BlockSpec((pl.Squeezed(), C, tile_s, L), lambda n, i: (n, 0, i, 0)),
            pl.BlockSpec((pl.Squeezed(), tile_s, L), lambda n, i: (n, i, 0)),
        ],
        out_specs=pl.BlockSpec((pl.Squeezed(), tile_s, L), lambda n, i: (n, i, 0)),
        compiler_params=pltpu.CompilerParams(
            dimension_semantics=("parallel", "parallel"),
            vmem_limit_bytes=32 * 1024 * 1024,
        ),
    )(score_ncsl, target_nsl)


def ohem_cross_entropy(score, target, *, ignore_label=-1, thresh=0.7,
                       min_kept=100000, tile_pixels=4096):
    """Equivalent of OhemCrossEntropy.forward with config.MODEL.NUM_OUTPUTS == 1 and
    config.LOSS.BALANCE_WEIGHTS == [1.0]  (i.e. 1.0 * self._ohem_forward(score, target)).

    score:  (N, C, H, W) float (NCHW convention, any float dtype; math is f32 in-kernel)
    target: (N, H, W)    int   (ignore_label marks ignored pixels)
    """
    min_kept = max(1, min_kept)
    N, C, H, W = score.shape
    # TODO(synk): F.interpolate bilinear resize when (ph, pw) != (h, w) is not implemented;
    # this path assumes score and target share spatial dims.
    assert target.shape == (N, H, W)
    HW = H * W
    P = N * HW

    tgt_flat = target.reshape(-1).astype(jnp.int32)

    # Keep NCHW; only free reshapes on the hot tensor (no transpose, no f32 upcast).
    LANES = 128
    HW_pad = LANES * ((HW + LANES - 1) // LANES)
    score_r = score.reshape(N, C, HW)
    target_r = target.astype(jnp.int32).reshape(N, HW)
    if HW_pad != HW:
        # Rare fallback: segmentation H*W is usually a multiple of 128.
        score_r = jnp.pad(score_r, ((0, 0), (0, 0), (0, HW_pad - HW)))
        target_r = jnp.pad(target_r, ((0, 0), (0, HW_pad - HW)),
                           constant_values=ignore_label)
    S = HW_pad // LANES
    score_r = score_r.reshape(N, C, S, LANES)
    target_r = target_r.reshape(N, S, LANES)

    loss_nsl = _run_pixel_kernel(score_r, target_r, ignore_label, tile_pixels)
    pixel_losses = loss_nsl.reshape(N, HW_pad)[:, :HW].reshape(-1)          # (P,)

    # --- OHEM threshold selection (plain-JAX glue) ---
    valid = tgt_flat != ignore_label
    n_valid = jnp.sum(valid.astype(jnp.int32))
    # Softmax prob of the target class: exp(-CE loss) for valid pixels (ignored pixels
    # never contribute — they are masked out of both the selection and the kept set).
    prob = jnp.exp(-pixel_losses)

    # Exact k-th smallest prob among valid pixels via top_k (avoids a full O(P log P) sort).
    k_static = int(min(min_kept + 1, P))
    neg_small, _ = jax.lax.top_k(jnp.where(valid, -prob, -jnp.inf), k_static)
    smallest = -neg_small                                  # ascending; invalid -> +inf
    k_idx = jnp.clip(jnp.minimum(jnp.int32(min_kept), n_valid - 1), 0, k_static - 1)
    min_value = smallest[k_idx]
    threshold = jnp.maximum(min_value, jnp.float32(thresh))

    keep = valid & (prob < threshold)
    kept_sum = jnp.sum(jnp.where(keep, pixel_losses, 0.0))
    kept_cnt = jnp.sum(keep.astype(jnp.float32))
    # torch's pixel_losses.mean() yields NaN for an empty keep set; guard to 0 instead.
    return jnp.where(kept_cnt > 0, kept_sum / jnp.maximum(kept_cnt, 1.0),
                     jnp.float32(0.0))


def _reference(score, target, ignore_label=-1, thresh=0.7, min_kept=100000):
    """Pure-JAX reference of _ohem_forward for a correctness check."""
    min_kept = max(1, min_kept)
    N, C, H, W = score.shape
    logits = jnp.transpose(score, (0, 2, 3, 1)).reshape(-1, C).astype(jnp.float32)
    tgt = target.reshape(-1).astype(jnp.int32)
    valid = tgt != ignore_label
    t = jnp.where(valid, tgt, 0)
    lse = jax.scipy.special.logsumexp(logits, axis=1)
    logit_t = jnp.take_along_axis(logits, t[:, None], axis=1)[:, 0]
    loss = jnp.where(valid, lse - logit_t, 0.0)
    prob = jnp.exp(logit_t - lse)
    n_valid = jnp.sum(valid.astype(jnp.int32))
    sorted_pred = jnp.sort(jnp.where(valid, prob, jnp.inf))
    k = jnp.minimum(jnp.int32(min_kept), n_valid - 1)
    threshold = jnp.maximum(sorted_pred[k], jnp.float32(thresh))
    keep = valid & (prob < threshold)
    return jnp.sum(jnp.where(keep, loss, 0.0)) / jnp.sum(keep.astype(jnp.float32))


if __name__ == "__main__":
    key = jax.random.PRNGKey(0)
    k_score, k_tgt, k_ign = jax.random.split(key, 3)

    N, C, H, W = 2, 4, 16, 16
    IGNORE = -1
    score = jax.random.normal(k_score, (N, C, H, W), dtype=jnp.float32) * 2.0
    target = jax.random.randint(k_tgt, (N, H, W), 0, C, dtype=jnp.int32)
    # sprinkle some ignored pixels
    ignore_mask = jax.random.uniform(k_ign, (N, H, W)) < 0.1
    target = jnp.where(ignore_mask, IGNORE, target)

    loss_fn = jax.jit(functools.partial(
        ohem_cross_entropy, ignore_label=IGNORE, thresh=0.7, min_kept=100))
    loss = loss_fn(score, target)
    jax.block_until_ready(loss)

    ref = _reference(score, target, ignore_label=IGNORE, thresh=0.7, min_kept=100)
    assert jnp.isfinite(loss), "loss is not finite"
    assert jnp.allclose(loss, ref, rtol=1e-5, atol=1e-5), (loss, ref)

    print("KERNEL_OK")
</pallas_src>

<mosaic_0001>
module attributes {stable_mosaic.version = 11 : i64} {
  func.func @_ohem_pixel_kernel(%arg0: i32, %arg1: i32, %arg2: memref<1x4x2x128xf32, #tpu.memory_space<vmem>>, %arg3: memref<1x2x128xi32, #tpu.memory_space<vmem>>, %arg4: memref<1x2x128xf32, #tpu.memory_space<vmem>>) attributes {dimension_semantics = [#tpu.dimension_semantics<parallel>, #tpu.dimension_semantics<parallel>], iteration_bounds = array<i64: 2, 1>, scalar_prefetch = 0 : i64, scratch_operands = 0 : i64, tpu.core_type = #tpu.core_type<tc>, window_params = [{transform_indices = @transform_0, window_bounds = array<i64: 1, 4, 2, 128>}, {transform_indices = @transform_1, window_bounds = array<i64: 1, 2, 128>}, {transform_indices = @transform_2, window_bounds = array<i64: 1, 2, 128>}]} {
    %c0 = arith.constant 0 : index
    %c0_0 = arith.constant 0 : index
    %c0_1 = arith.constant 0 : index
    %c0_2 = arith.constant 0 : index
    %0 = vector.load %arg2[%c0, %c0_0, %c0_1, %c0_2] : memref<1x4x2x128xf32, #tpu.memory_space<vmem>>, vector<1x4x2x128xf32>
    %1 = vector.shape_cast %0 : vector<1x4x2x128xf32> to vector<4x2x128xf32>
    %c0_3 = arith.constant 0 : index
    %c0_4 = arith.constant 0 : index
    %c0_5 = arith.constant 0 : index
    %2 = vector.load %arg3[%c0_3, %c0_4, %c0_5] : memref<1x2x128xi32, #tpu.memory_space<vmem>>, vector<1x2x128xi32>
    %3 = vector.shape_cast %2 : vector<1x2x128xi32> to vector<2x128xi32>
    %c-1_i32 = arith.constant -1 : i32
    %4 = vector.broadcast %c-1_i32 : i32 to vector<2x128xi32>
    %5 = arith.cmpi ne, %3, %4 : vector<2x128xi32>
    %c0_i32 = arith.constant 0 : i32
    %6 = vector.broadcast %c0_i32 : i32 to vector<2x128xi32>
    %7 = arith.select %5, %3, %6 : vector<2x128xi1>, vector<2x128xi32>
    %cst = arith.constant dense<0xFF800000> : vector<2x128xf32>
    %8 = vector.multi_reduction <maximumf>, %1, %cst [0] : vector<4x2x128xf32> to vector<2x128xf32>
    %9 = vector.shape_cast %8 : vector<2x128xf32> to vector<1x2x128xf32>
    %10 = vector.broadcast %9 : vector<1x2x128xf32> to vector<4x2x128xf32>
    %11 = arith.subf %1, %10 : vector<4x2x128xf32>
    %12 = math.exp %11 : vector<4x2x128xf32>
    %cst_6 = arith.constant dense<0.000000e+00> : vector<2x128xf32>
    %13 = vector.multi_reduction <add>, %12, %cst_6 [0] : vector<4x2x128xf32> to vector<2x128xf32>
    %14 = math.log %13 : vector<2x128xf32>
    %15 = arith.addf %8, %14 : vector<2x128xf32>
    %16 = tpu.iota {dimensions = array<i32: 0>} : vector<4x2x128xi32>
    %17 = vector.shape_cast %7 : vector<2x128xi32> to vector<1x2x128xi32>
    %18 = vector.broadcast %17 : vector<1x2x128xi32> to vector<4x2x128xi32>
    %19 = arith.cmpi eq, %16, %18 : vector<4x2x128xi32>
    %cst_7 = arith.constant 0.000000e+00 : f32
    %20 = vector.broadcast %cst_7 : f32 to vector<4x2x128xf32>
    %21 = arith.select %19, %1, %20 : vector<4x2x128xi1>, vector<4x2x128xf32>
    %cst_8 = arith.constant dense<0.000000e+00> : vector<2x128xf32>
    %22 = vector.multi_reduction <add>, %21, %cst_8 [0] : vector<4x2x128xf32> to vector<2x128xf32>
    %23 = arith.subf %15, %22 : vector<2x128xf32>
    %cst_9 = arith.constant 0.000000e+00 : f32
    %24 = vector.broadcast %cst_9 : f32 to vector<2x128xf32>
    %25 = arith.select %5, %23, %24 : vector<2x128xi1>, vector<2x128xf32>
    %c0_10 = arith.constant 0 : index
    %c0_11 = arith.constant 0 : index
    %c0_12 = arith.constant 0 : index
    %26 = vector.load %arg4[%c0_10, %c0_11, %c0_12] : memref<1x2x128xf32, #tpu.memory_space<vmem>>, vector<1x2x128xf32>
    %27 = vector.shape_cast %26 : vector<1x2x128xf32> to vector<2x128xf32>
    %28 = vector.shape_cast %25 : vector<2x128xf32> to vector<1x2x128xf32>
    tpu.vector_store %arg4[%c0_10, %c0_11, %c0_12], %28 {strides = array<i32>} : memref<1x2x128xf32, #tpu.memory_space<vmem>>, vector<1x2x128xf32>,
    return
  }
  func.func @transform_0(%arg0: i32, %arg1: i32) -> (i32, i32, i32, i32) {
    %c0_i32 = arith.constant 0 : i32
    %c0_i32_0 = arith.constant 0 : i32
    %c0_i32_1 = arith.constant 0 : i32
    return %arg0, %c0_i32, %arg1, %c0_i32_0 : i32, i32, i32, i32
  }
  func.func @transform_1(%arg0: i32, %arg1: i32) -> (i32, i32, i32) {
    %c0_i32 = arith.constant 0 : i32
    %c0_i32_0 = arith.constant 0 : i32
    return %arg0, %arg1, %c0_i32 : i32, i32, i32
  }
  func.func @transform_2(%arg0: i32, %arg1: i32) -> (i32, i32, i32) {
    %c0_i32 = arith.constant 0 : i32
    %c0_i32_0 = arith.constant 0 : i32
    return %arg0, %arg1, %c0_i32 : i32, i32, i32
  }
}

</mosaic_0001>

<bundles_post_ra>
// kernel: ohem_cross_entropy.1
= control target key start
LH: loop header
LB: loop body
LE: loop exit
PB: predicated region body
PF: predicated region fallthrough
CT: control target
= control target key end

     0   :  { %s433_s9 = smov 0   ;;  %s435_s10 = smov 0   ;;  %s491_s0 = inlined_call_operand.vmem [shape: f32[2,4,2,128], index: 0, kind: input, shape index: {}]   ;;  %s492_s1 = inlined_call_operand.vmem [shape: s32[2,2,128], index: 1, kind: input, shape index: {}]   ;;  %s493_s2 = inlined_call_operand.vmem [shape: f32[2,2,128], index: 2, kind: output, shape index: {}]  }
   0x1   :  { %s437_s11 = smov 0  }
   0x2 LB: > { %s24_s12 = sadd.s32 1, %s412_s10  ;;  %p352_p0 = scmp.ge.s32.totalorder %s416_s11, 1  ;;  %s416_s11 = sphi %s437_s11, %s12_s11   ;;  %s412_s10 = sphi %s435_s10, %s495_s10   ;;  %s408_s9 = sphi %s433_s9, %s494_s9  }
   0x3   : > { %p26_p1 = scmp.ge.s32.totalorder %s24_s12, 2  ;;  %p145_p2 = scmp.lt.s32.totalorder %s416_s11, 3 }
   0x5   : > { %s497_s12 = smov (%p26_p1, %s24_s12), 0  ;;  %p146_p3 = pnand %p352_p0, %p145_p2 }
   0x6   : > { %p179_p4 = scmp.lt.s32.totalorder (!%p146_p3), %s408_s9, 1 }
   0x7   : > { %149 = sbr.rel (%p146_p3) target bundleno = 56 (0x38), region = 28 }
   0xc   : > { %s499_s9 = smov (!%p179_p4, %s408_s9), 1  ;;  %vm208_vm0 = vcmask 1041408  }
   0xd   : > { %s359_s13 = sshll.u32 %s499_s9, 3  ;;  %s355_s17 = sshll.u32 %s499_s9, 1 }
   0xe   : > { %s186_s16 = scalar_lea.vmem %s491_s0, %s359_s13  ;;  %s193_s20 = scalar_lea.vmem %s492_s1, %s355_s17 }
   0xf   : > { %v201_v0 = vld [vmem:[%s186_s16] sm:$0x3]  ;;  %v202_v1 = vld [vmem:[%s186_s16 + $0x2] sm:$0x3]  ;;  %v203_v2 = vld [vmem:[%s186_s16 + $0x4] sm:$0x3]  ;;  %s200_s23 = scalar_lea.vmem %s493_s2, %s355_s17 }
  0x10   : > { %v204_v3 = vld [vmem:[%s186_s16 + $0x6] sm:$0x3]  ;;  %v209_v4 = vsel %vm208_vm0, %v201_v0, -inf  ;;  %v210_v5 = vsel %vm208_vm0, %v202_v1, -inf  ;;  %v211_v6 = vsel %vm208_vm0, %v203_v2, -inf }
  0x11   : > { %v212_v7 = vsel %vm208_vm0, %v204_v3, -inf  ;;  %v213_v8 = vmax.f32 %v209_v4, %v210_v5  ;;  %v205_v11 = vld [vmem:[%s193_s20] sm:$0x3] }
  0x12   : > { %v214_v9 = vmax.f32 %v211_v6, %v212_v7  ;;  %vm206_vm1 = vcmp.ne.s32.totalorder %v205_v11, 4294967295 }
  0x13   : > { %v207_v20 = vsel %vm206_vm1, %v205_v11, 0 }
  0x14   : > { %v215_v10 = vmax.f32 %v213_v8, %v214_v9  ;;  %vm238_vm2 = vcmp.eq.s32.totalorder %v207_v20, 0  ;;  %vm239_vm3 = vcmp.eq.s32.totalorder %v207_v20, 1  ;;  %vm240_vm4 = vcmp.eq.s32.totalorder %v207_v20, 2 }
  0x15   : > { %v242_v26 = vsel %vm238_vm2, %v201_v0, 0.0  ;;  %v243_v27 = vsel %vm239_vm3, %v202_v1, 0.0  ;;  %v244_v35 = vsel %vm240_vm4, %v203_v2, 0.0  ;;  %vm241_vm5 = vcmp.eq.s32.totalorder %v207_v20, 3 }
  0x16   : > { %v216_v12 = vsub.f32 %v201_v0, %v215_v10  ;;  %v217_v13 = vsub.f32 %v202_v1, %v215_v10  ;;  %v218_v14 = vsub.f32 %v203_v2, %v215_v10  ;;  %v219_v15 = vsub.f32 %v204_v3, %v215_v10 }
  0x17   : > { %v246_v33 = vsel %vm208_vm0, %v242_v26, 0.0  ;;  %v247_v34 = vsel %vm208_vm0, %v243_v27, 0.0  ;;  %v249_v38 = vsel %vm208_vm0, %v244_v35, 0.0  ;;  %v245_v39 = vsel %vm241_vm5, %v204_v3, 0.0 }
  0x18   : > { %v220_v16 = vmul.f32 1.442695, %v216_v12  ;;  %v222_v17 = vmul.f32 1.442695, %v217_v13  ;;  %v224_v18 = vmul.f32 1.442695, %v218_v14  ;;  %v248_v37 = vadd.f32 %v247_v34, %v246_v33 }
  0x19   : > { %v226_v19 = vmul.f32 1.442695, %v219_v15  ;;  %v251_v41 = vsel %vm208_vm0, %v245_v39, 0.0 }
  0x1a   : > { %384 = vpow2.f32 %v220_v16  ;;  %v250_v40 = vadd.f32 %v249_v38, %v248_v37 }
  0x1b   : > { %386 = vpow2.f32 %v222_v17 }
  0x1c   : > { %388 = vpow2.f32 %v224_v18  ;;  %v252_v44 = vadd.f32 %v251_v41, %v250_v40 }
  0x1d   : > { %390 = vpow2.f32 %v226_v19 }
  0x20   : > { %v385_v21 = vpop.eup %384 }
  0x21   : > { %v387_v22 = vpop.eup %386  ;;  %v228_v23 = vsel %vm208_vm0, %v385_v21, 0.0 }
  0x22   : > { %v389_v24 = vpop.eup %388  ;;  %v229_v25 = vsel %vm208_vm0, %v387_v22, 0.0 }
  0x23   : > { %v391_v28 = vpop.eup %390  ;;  %v230_v29 = vadd.f32 %v229_v25, %v228_v23  ;;  %v231_v30 = vsel %vm208_vm0, %v389_v24, 0.0 }
  0x24   : > { %v233_v31 = vsel %vm208_vm0, %v391_v28, 0.0 }
  0x25   : > { %v232_v32 = vadd.f32 %v231_v30, %v230_v29 }
  0x27   : > { %v234_v36 = vadd.f32 %v233_v31, %v232_v32 }
  0x29   : > { %392 = vlog2.f32 %v234_v36 }
  0x2f   : > { %v393_v42 = vpop.eup %392 }
  0x30   : > { %v236_v43 = vmul.f32 0.6931472, %v393_v42 }
  0x32   : > { %v237_v45 = vadd.f32 %v236_v43, %v215_v10 }
  0x34   : > { %v253_v46 = vsub.f32 %v237_v45, %v252_v44 }
  0x36   : > { %v254_v47 = vsel %vm206_vm1, %v253_v46, 0.0 }
  0x37   : > { %255 = vst [vmem:[%s200_s23] sm:$0x3] %v254_v47 }
  0x38 PF: > { %s12_s11 = sadd.s32 1, %s416_s11   ;;  %s494_s9 = smov %s412_s10 }
  0x39   : > { %p9_p5 = scmp.ge.s32.totalorder %s12_s11, 4   ;;  %s495_s10 = smov %s497_s12 }
  0x3b   :  { %11 = sbr.rel (!%p9_p5) target bundleno = 2 (0x2), region = 61 }

</bundles_post_ra>
